<compile_context>
chip_gen: v6e
topology: v6e:2x2x1
jax: 0.10.0
libtpu: 0.0.40
codegen_flags: <defaults>
</compile_context>

<pallas_src>
import jax
import jax.numpy as jnp
from jax.experimental import pallas as pl
from jax.experimental.pallas import tpu as pltpu

FEATURE_DIM = 10
H1, H2, H3, OUT = 64, 128, 256, 100
H1_PAD, OUT_PAD = 128, 128          # lane-dense padding (multiples of 128)


def _generator_kernel(x_ref,
                      w1_ref, b1_ref,
                      w2_ref, b2_ref,
                      w3_ref, b3_ref,
                      w4_ref, b4_ref,
                      o_ref):
    """One (TB, FEATURE_DIM) batch tile through the whole 4-layer MLP.

    Weights are bf16 (MXU-native), biases/activations f32, MXU accumulation
    f32. All hidden/output widths are padded to multiples of 128 lanes so
    every intermediate and the output store are lane-dense.
    """
    x = x_ref[...]                                                # (TB, 10) f32

    h = jnp.dot(x.astype(jnp.bfloat16), w1_ref[...],
                preferred_element_type=jnp.float32) + b1_ref[...]
    h = jnp.maximum(h, 0.0)

    h = jnp.dot(h.astype(jnp.bfloat16), w2_ref[...],
                preferred_element_type=jnp.float32) + b2_ref[...]
    h = jnp.maximum(h, 0.0)

    h = jnp.dot(h.astype(jnp.bfloat16), w3_ref[...],
                preferred_element_type=jnp.float32) + b3_ref[...]
    h = jnp.maximum(h, 0.0)

    z = jnp.dot(h.astype(jnp.bfloat16), w4_ref[...],
                preferred_element_type=jnp.float32) + b4_ref[...]

    # Numerically safe sigmoid: clamp the exp argument so we never feed +inf
    # into the approximate reciprocal (exp(60) ~ 1.1e26, recip ~ 9e-27 ~ 0,
    # identical to sigmoid(z) at f32/bf16 precision for any real z).
    # exp and the approximate reciprocal both run on the EUP slot.
    e = jnp.exp(jnp.minimum(-z, 60.0))
    o_ref[...] = pl.reciprocal(1.0 + e, approx=True).astype(o_ref.dtype)


def _prepare_padded_params(params):
    """Zero-pad 64->128 (H1) and 100->128 (OUT); weights -> bf16, biases f32."""
    w1, b1 = params["w1"], params["b1"]          # (10, 64),  (1, 64)
    w2, b2 = params["w2"], params["b2"]          # (64, 128), (1, 128)
    w3, b3 = params["w3"], params["b3"]          # (128, 256),(1, 256)
    w4, b4 = params["w4"], params["b4"]          # (256, 100),(1, 100)

    w1p = jnp.pad(w1, ((0, 0), (0, H1_PAD - H1))).astype(jnp.bfloat16)
    b1p = jnp.pad(b1, ((0, 0), (0, H1_PAD - H1)))
    w2p = jnp.pad(w2, ((0, H1_PAD - H1), (0, 0))).astype(jnp.bfloat16)
    w3p = w3.astype(jnp.bfloat16)
    w4p = jnp.pad(w4, ((0, 0), (0, OUT_PAD - OUT))).astype(jnp.bfloat16)
    b4p = jnp.pad(b4, ((0, 0), (0, OUT_PAD - OUT)))
    return (w1p, b1p, w2p, b2, w3p, b3, w4p, b4p)


def _vmem_limit_bytes(TB, out_itemsize):
    """Scoped-VMEM request sized to the actual working set (with 2x margin)."""
    lane = 128
    x_tiles = 2 * TB * lane * 4               # double-buffered x tile (lane-padded)
    o_tiles = 2 * TB * lane * out_itemsize    # double-buffered output tile
    weights = 2 * 2 * (FEATURE_DIM * H1_PAD + H1_PAD * H2 + H2 * H3 + H3 * OUT_PAD)
    biases = 2 * 4 * (H1_PAD + H2 + H3 + OUT_PAD)
    interm = TB * 4 * (H1_PAD + H2 + H3 + OUT_PAD)   # f32 activations
    interm += TB * 2 * (H1_PAD + H2 + H3)            # bf16 casts feeding the MXU
    total = x_tiles + o_tiles + weights + biases + interm
    # 2x margin, floor at 16 MiB, cap below v7x's 64 MiB physical VMEM.
    return int(min(max(2 * total, 16 << 20), 48 << 20))


def generator_net_forward(x, params, *, block_batch=2048, min_pallas_batch=256,
                          out_dtype=jnp.float32, return_padded=False):
    """x: (B, FEATURE_DIM) float32. params from init_params (PyTorch layout^T).

    return_padded=True returns the lane-dense (B, 128) kernel output directly
    (no post-kernel column-slice copy); columns [OUT:] are sigmoid(bias_pad)
    garbage and should be ignored by the consumer.
    """
    B = x.shape[0]
    if B < min_pallas_batch:
        # Small batch: Pallas launch + a single un-pipelined grid step loses to
        # XLA's fused small-GEMM path.
        out = reference_forward(x, params).astype(out_dtype)
        if return_padded:
            out = jnp.pad(out, ((0, 0), (0, OUT_PAD - OUT)))
        return out

    padded_params = _prepare_padded_params(params)

    # Batch tile: multiple of 8 sublanes, and chosen so the grid has at least
    # two balanced steps (keeps both v7x TensorCores busy and gives the
    # pipeline something to overlap), while block_batch caps the working set.
    n_steps = max(2, pl.cdiv(B, block_batch))
    TB = max(8, pl.cdiv(pl.cdiv(B, n_steps), 8) * 8)
    grid = (pl.cdiv(B, TB),)

    out_itemsize = jnp.dtype(out_dtype).itemsize

    out_padded = pl.pallas_call(
        _generator_kernel,
        out_shape=jax.ShapeDtypeStruct((B, OUT_PAD), out_dtype),
        grid=grid,
        in_specs=[
            pl.BlockSpec((TB, FEATURE_DIM), lambda i: (i, 0)),      # x tile
            pl.BlockSpec((FEATURE_DIM, H1_PAD), lambda i: (0, 0)),  # w1
            pl.BlockSpec((1, H1_PAD), lambda i: (0, 0)),            # b1
            pl.BlockSpec((H1_PAD, H2), lambda i: (0, 0)),           # w2
            pl.BlockSpec((1, H2), lambda i: (0, 0)),                # b2
            pl.BlockSpec((H2, H3), lambda i: (0, 0)),               # w3
            pl.BlockSpec((1, H3), lambda i: (0, 0)),                # b3
            pl.BlockSpec((H3, OUT_PAD), lambda i: (0, 0)),          # w4
            pl.BlockSpec((1, OUT_PAD), lambda i: (0, 0)),           # b4
        ],
        out_specs=pl.BlockSpec((TB, OUT_PAD), lambda i: (i, 0)),
        compiler_params=pltpu.CompilerParams(
            # batch tiles are independent -> shard across v7x's 2 TensorCores
            dimension_semantics=("parallel",),
            vmem_limit_bytes=_vmem_limit_bytes(TB, out_itemsize),
        ),
    )(x, *padded_params)

    if return_padded:
        return out_padded
    # Column-only slice back to the module's (B, 100) shape. Callers that can
    # consume the padded buffer should pass return_padded=True to avoid this
    # extra copy over the dominant output traffic.
    return out_padded[:, :OUT]


def init_params(key):
    """PyTorch-style uniform init; weights stored as (in, out), biases (1, out)."""
    dims = [(FEATURE_DIM, H1), (H1, H2), (H2, H3), (H3, OUT)]
    params = {}
    for i, (fan_in, fan_out) in enumerate(dims, start=1):
        key, kw, kb = jax.random.split(key, 3)
        bound = 1.0 / jnp.sqrt(fan_in)
        params[f"w{i}"] = jax.random.uniform(
            kw, (fan_in, fan_out), jnp.float32, minval=-bound, maxval=bound)
        params[f"b{i}"] = jax.random.uniform(
            kb, (1, fan_out), jnp.float32, minval=-bound, maxval=bound)
    return params


def reference_forward(x, params):
    """Exact f32 GeneratorNet semantics (also used as small-batch fast path)."""
    h = jnp.maximum(x @ params["w1"] + params["b1"], 0.0)
    h = jnp.maximum(h @ params["w2"] + params["b2"], 0.0)
    h = jnp.maximum(h @ params["w3"] + params["b3"], 0.0)
    return jax.nn.sigmoid(h @ params["w4"] + params["b4"])


def reference_forward_bf16(x, params):
    """Reference mirroring the kernel's bf16-MXU / f32-accumulate precision."""
    def dot(a, w):
        return jnp.dot(a.astype(jnp.bfloat16), w.astype(jnp.bfloat16),
                       preferred_element_type=jnp.float32)
    h = jnp.maximum(dot(x, params["w1"]) + params["b1"], 0.0)
    h = jnp.maximum(dot(h, params["w2"]) + params["b2"], 0.0)
    h = jnp.maximum(dot(h, params["w3"]) + params["b3"], 0.0)
    return jax.nn.sigmoid(dot(h, params["w4"]) + params["b4"])


if __name__ == "__main__":
    key = jax.random.PRNGKey(0)
    key, kx = jax.random.split(key)
    params = init_params(key)

    # Pallas path: B chosen so the two-step grid and the masked partial last
    # block (B not a multiple of TB) are both exercised.
    B = 300
    x = jax.random.normal(kx, (B, FEATURE_DIM), jnp.float32)

    out = jax.block_until_ready(
        generator_net_forward(x, params, min_pallas_batch=0))
    assert out.shape == (B, OUT)

    ref_bf16 = reference_forward_bf16(x, params)   # precision-matched check
    ref_f32 = reference_forward(x, params)         # exact module semantics
    assert jnp.allclose(out, ref_bf16, atol=5e-3, rtol=5e-3)
    assert jnp.allclose(out, ref_f32, atol=3e-2, rtol=3e-2)

    # Padded-output path (no column-slice copy); first 100 columns match.
    out_pad = jax.block_until_ready(
        generator_net_forward(x, params, min_pallas_batch=0, return_padded=True))
    assert out_pad.shape == (B, OUT_PAD)
    assert jnp.allclose(out_pad[:, :OUT], out, atol=1e-6, rtol=1e-6)

    # Optional bf16 output (halves the dominant output writeback).
    out_bf16 = jax.block_until_ready(
        generator_net_forward(x, params, min_pallas_batch=0,
                              out_dtype=jnp.bfloat16))
    assert out_bf16.dtype == jnp.bfloat16
    assert jnp.allclose(out_bf16.astype(jnp.float32), ref_bf16,
                        atol=2e-2, rtol=2e-2)

    # Small batch falls back to the fused XLA path (kernel overhead not worth it).
    x_small = jax.random.normal(kx, (8, FEATURE_DIM), jnp.float32)
    out_small = jax.block_until_ready(generator_net_forward(x_small, params))
    assert out_small.shape == (8, OUT)
    assert jnp.allclose(out_small, reference_forward(x_small, params),
                        atol=1e-5, rtol=1e-5)

    print("KERNEL_OK")
</pallas_src>

<mosaic_0001>
module attributes {stable_mosaic.version = 11 : i64} {
  func.func @_generator_kernel(%arg0: i32, %arg1: memref<152x10xf32, #tpu.memory_space<vmem>>, %arg2: memref<10x128xbf16, #tpu.memory_space<vmem>>, %arg3: memref<1x128xf32, #tpu.memory_space<vmem>>, %arg4: memref<128x128xbf16, #tpu.memory_space<vmem>>, %arg5: memref<1x128xf32, #tpu.memory_space<vmem>>, %arg6: memref<128x256xbf16, #tpu.memory_space<vmem>>, %arg7: memref<1x256xf32, #tpu.memory_space<vmem>>, %arg8: memref<256x128xbf16, #tpu.memory_space<vmem>>, %arg9: memref<1x128xf32, #tpu.memory_space<vmem>>, %arg10: memref<152x128xf32, #tpu.memory_space<vmem>>) attributes {dimension_semantics = [#tpu.dimension_semantics<parallel>], iteration_bounds = array<i64: 2>, scalar_prefetch = 0 : i64, scratch_operands = 0 : i64, tpu.core_type = #tpu.core_type<tc>, window_params = [{transform_indices = @transform_0, window_bounds = array<i64: 152, 10>}, {pipeline_mode = #tpu.pipeline_mode<synchronous>, transform_indices = @transform_1, window_bounds = array<i64: 10, 128>}, {pipeline_mode = #tpu.pipeline_mode<synchronous>, transform_indices = @transform_2, window_bounds = array<i64: 1, 128>}, {pipeline_mode = #tpu.pipeline_mode<synchronous>, transform_indices = @transform_3, window_bounds = array<i64: 128, 128>}, {pipeline_mode = #tpu.pipeline_mode<synchronous>, transform_indices = @transform_4, window_bounds = array<i64: 1, 128>}, {pipeline_mode = #tpu.pipeline_mode<synchronous>, transform_indices = @transform_5, window_bounds = array<i64: 128, 256>}, {pipeline_mode = #tpu.pipeline_mode<synchronous>, transform_indices = @transform_6, window_bounds = array<i64: 1, 256>}, {pipeline_mode = #tpu.pipeline_mode<synchronous>, transform_indices = @transform_7, window_bounds = array<i64: 256, 128>}, {pipeline_mode = #tpu.pipeline_mode<synchronous>, transform_indices = @transform_8, window_bounds = array<i64: 1, 128>}, {transform_indices = @transform_9, window_bounds = array<i64: 152, 128>}]} {
    %c0 = arith.constant 0 : index
    %c0_0 = arith.constant 0 : index
    %0 = vector.load %arg1[%c0, %c0_0] : memref<152x10xf32, #tpu.memory_space<vmem>>, vector<152x10xf32>
    %1 = arith.truncf %0 : vector<152x10xf32> to vector<152x10xbf16>
    %c0_1 = arith.constant 0 : index
    %c0_2 = arith.constant 0 : index
    %2 = vector.load %arg2[%c0_1, %c0_2] : memref<10x128xbf16, #tpu.memory_space<vmem>>, vector<10x128xbf16>
    %cst = arith.constant dense<0.000000e+00> : vector<152x128xf32>
    %3 = tpu.matmul %1, %2, %cst {dimension_numbers = #tpu.dot_dimension_numbers<[1], [0], [0], [1], [0, 0, 1, 1], [], []>} : vector<152x10xbf16>, vector<10x128xbf16>, vector<152x128xf32> -> vector<152x128xf32>
    %c0_3 = arith.constant 0 : index
    %c0_4 = arith.constant 0 : index
    %4 = vector.load %arg3[%c0_3, %c0_4] : memref<1x128xf32, #tpu.memory_space<vmem>>, vector<1x128xf32>
    %5 = vector.broadcast %4 : vector<1x128xf32> to vector<152x128xf32>
    %6 = arith.addf %3, %5 : vector<152x128xf32>
    %cst_5 = arith.constant 0.000000e+00 : f32
    %7 = vector.broadcast %cst_5 : f32 to vector<152x128xf32>
    %8 = arith.maximumf %6, %7 : vector<152x128xf32>
    %9 = arith.truncf %8 : vector<152x128xf32> to vector<152x128xbf16>
    %c0_6 = arith.constant 0 : index
    %c0_7 = arith.constant 0 : index
    %10 = vector.load %arg4[%c0_6, %c0_7] : memref<128x128xbf16, #tpu.memory_space<vmem>>, vector<128x128xbf16>
    %cst_8 = arith.constant dense<0.000000e+00> : vector<152x128xf32>
    %11 = tpu.matmul %9, %10, %cst_8 {dimension_numbers = #tpu.dot_dimension_numbers<[1], [0], [0], [1], [0, 0, 1, 1], [], []>} : vector<152x128xbf16>, vector<128x128xbf16>, vector<152x128xf32> -> vector<152x128xf32>
    %c0_9 = arith.constant 0 : index
    %c0_10 = arith.constant 0 : index
    %12 = vector.load %arg5[%c0_9, %c0_10] : memref<1x128xf32, #tpu.memory_space<vmem>>, vector<1x128xf32>
    %13 = vector.broadcast %12 : vector<1x128xf32> to vector<152x128xf32>
    %14 = arith.addf %11, %13 : vector<152x128xf32>
    %cst_11 = arith.constant 0.000000e+00 : f32
    %15 = vector.broadcast %cst_11 : f32 to vector<152x128xf32>
    %16 = arith.maximumf %14, %15 : vector<152x128xf32>
    %17 = arith.truncf %16 : vector<152x128xf32> to vector<152x128xbf16>
    %c0_12 = arith.constant 0 : index
    %c0_13 = arith.constant 0 : index
    %18 = vector.load %arg6[%c0_12, %c0_13] : memref<128x256xbf16, #tpu.memory_space<vmem>>, vector<128x256xbf16>
    %cst_14 = arith.constant dense<0.000000e+00> : vector<152x256xf32>
    %19 = tpu.matmul %17, %18, %cst_14 {dimension_numbers = #tpu.dot_dimension_numbers<[1], [0], [0], [1], [0, 0, 1, 1], [], []>} : vector<152x128xbf16>, vector<128x256xbf16>, vector<152x256xf32> -> vector<152x256xf32>
    %c0_15 = arith.constant 0 : index
    %c0_16 = arith.constant 0 : index
    %20 = vector.load %arg7[%c0_15, %c0_16] : memref<1x256xf32, #tpu.memory_space<vmem>>, vector<1x256xf32>
    %21 = vector.broadcast %20 : vector<1x256xf32> to vector<152x256xf32>
    %22 = arith.addf %19, %21 : vector<152x256xf32>
    %cst_17 = arith.constant 0.000000e+00 : f32
    %23 = vector.broadcast %cst_17 : f32 to vector<152x256xf32>
    %24 = arith.maximumf %22, %23 : vector<152x256xf32>
    %25 = arith.truncf %24 : vector<152x256xf32> to vector<152x256xbf16>
    %c0_18 = arith.constant 0 : index
    %c0_19 = arith.constant 0 : index
    %26 = vector.load %arg8[%c0_18, %c0_19] : memref<256x128xbf16, #tpu.memory_space<vmem>>, vector<256x128xbf16>
    %cst_20 = arith.constant dense<0.000000e+00> : vector<152x128xf32>
    %27 = tpu.matmul %25, %26, %cst_20 {dimension_numbers = #tpu.dot_dimension_numbers<[1], [0], [0], [1], [0, 0, 1, 1], [], []>} : vector<152x256xbf16>, vector<256x128xbf16>, vector<152x128xf32> -> vector<152x128xf32>
    %c0_21 = arith.constant 0 : index
    %c0_22 = arith.constant 0 : index
    %28 = vector.load %arg9[%c0_21, %c0_22] : memref<1x128xf32, #tpu.memory_space<vmem>>, vector<1x128xf32>
    %29 = vector.broadcast %28 : vector<1x128xf32> to vector<152x128xf32>
    %30 = arith.addf %27, %29 : vector<152x128xf32>
    %cst_23 = arith.constant 0.000000e+00 : f32
    %31 = vector.broadcast %cst_23 : f32 to vector<152x128xf32>
    %32 = arith.subf %31, %30 : vector<152x128xf32>
    %cst_24 = arith.constant 6.000000e+01 : f32
    %33 = vector.broadcast %cst_24 : f32 to vector<152x128xf32>
    %34 = arith.minimumf %32, %33 : vector<152x128xf32>
    %35 = math.exp %34 : vector<152x128xf32>
    %cst_25 = arith.constant 1.000000e+00 : f32
    %36 = vector.broadcast %cst_25 : f32 to vector<152x128xf32>
    %37 = arith.addf %36, %35 : vector<152x128xf32>
    %38 = tpu.reciprocal %37 {approx = true} : vector<152x128xf32> -> vector<152x128xf32>
    %c0_26 = arith.constant 0 : index
    %c0_27 = arith.constant 0 : index
    %39 = vector.load %arg10[%c0_26, %c0_27] : memref<152x128xf32, #tpu.memory_space<vmem>>, vector<152x128xf32>
    tpu.vector_store %arg10[%c0_26, %c0_27], %38 {strides = array<i32>} : memref<152x128xf32, #tpu.memory_space<vmem>>, vector<152x128xf32>,
    return
  }
  func.func @transform_0(%arg0: i32) -> (i32, i32) {
    %c0_i32 = arith.constant 0 : i32
    %c0_i32_0 = arith.constant 0 : i32
    return %arg0, %c0_i32 : i32, i32
  }
  func.func @transform_1(%arg0: i32) -> (i32, i32) {
    %c0_i32 = arith.constant 0 : i32
    %c0_i32_0 = arith.constant 0 : i32
    %c0_i32_1 = arith.constant 0 : i32
    return %c0_i32, %c0_i32_0 : i32, i32
  }
  func.func @transform_2(%arg0: i32) -> (i32, i32) {
    %c0_i32 = arith.constant 0 : i32
    %c0_i32_0 = arith.constant 0 : i32
    %c0_i32_1 = arith.constant 0 : i32
    return %c0_i32, %c0_i32_0 : i32, i32
  }
  func.func @transform_3(%arg0: i32) -> (i32, i32) {
    %c0_i32 = arith.constant 0 : i32
    %c0_i32_0 = arith.constant 0 : i32
    %c0_i32_1 = arith.constant 0 : i32
    return %c0_i32, %c0_i32_0 : i32, i32
  }
  func.func @transform_4(%arg0: i32) -> (i32, i32) {
    %c0_i32 = arith.constant 0 : i32
    %c0_i32_0 = arith.constant 0 : i32
    %c0_i32_1 = arith.constant 0 : i32
    return %c0_i32, %c0_i32_0 : i32, i32
  }
  func.func @transform_5(%arg0: i32) -> (i32, i32) {
    %c0_i32 = arith.constant 0 : i32
    %c0_i32_0 = arith.constant 0 : i32
    %c0_i32_1 = arith.constant 0 : i32
    return %c0_i32, %c0_i32_0 : i32, i32
  }
  func.func @transform_6(%arg0: i32) -> (i32, i32) {
    %c0_i32 = arith.constant 0 : i32
    %c0_i32_0 = arith.constant 0 : i32
    %c0_i32_1 = arith.constant 0 : i32
    return %c0_i32, %c0_i32_0 : i32, i32
  }
  func.func @transform_7(%arg0: i32) -> (i32, i32) {
    %c0_i32 = arith.constant 0 : i32
    %c0_i32_0 = arith.constant 0 : i32
    %c0_i32_1 = arith.constant 0 : i32
    return %c0_i32, %c0_i32_0 : i32, i32
  }
  func.func @transform_8(%arg0: i32) -> (i32, i32) {
    %c0_i32 = arith.constant 0 : i32
    %c0_i32_0 = arith.constant 0 : i32
    %c0_i32_1 = arith.constant 0 : i32
    return %c0_i32, %c0_i32_0 : i32, i32
  }
  func.func @transform_9(%arg0: i32) -> (i32, i32) {
    %c0_i32 = arith.constant 0 : i32
    %c0_i32_0 = arith.constant 0 : i32
    return %arg0, %c0_i32 : i32, i32
  }
}

</mosaic_0001>

<bundles_post_ra>
// kernel: tpu_custom_call.1
= control target key start
LH: loop header
LB: loop body
LE: loop exit
PB: predicated region body
PF: predicated region fallthrough
CT: control target
= control target key end

     0   :  { %14 = vsyncpa [#allocation3], 0  ;;  %s2454_s0 = inlined_call_operand.vmem [shape: f32[300,10], index: 0, kind: input, shape index: {}]   ;;  %s2455_s1 = inlined_call_operand.vmem [shape: bf16[10,128], index: 1, kind: input, shape index: {}]   ;;  %s2456_s2 = inlined_call_operand.vmem [shape: f32[1,128], index: 2, kind: input, shape index: {}]   ;;  %s2457_s3 = inlined_call_operand.vmem [shape: bf16[128,128], index: 3, kind: input, shape index: {}]   ;;  %s2458_s4 = inlined_call_operand.vmem [shape: f32[1,128], index: 4, kind: input, shape index: {}]   ;;  %s2459_s5 = inlined_call_operand.vmem [shape: bf16[128,256], index: 5, kind: input, shape index: {}]   ;;  %s2460_s6 = inlined_call_operand.vmem [shape: f32[1,256], index: 6, kind: input, shape index: {}]   ;;  %s2461_s7 = inlined_call_operand.vmem [shape: bf16[256,128], index: 7, kind: input, shape index: {}]   ;;  %s2462_s8 = inlined_call_operand.vmem [shape: f32[1,128], index: 8, kind: input, shape index: {}]   ;;  %s2463_s9 = inlined_call_operand.hbm [shape: f32[300,128], index: 9, kind: output, shape index: {}]  }
   0x1   :  { %16 = vsyncpa [#allocation3 + $0x1], 0  ;;  %s2046_s30 = smov 0   ;;  %s2048_s10 = smov 0  }
   0x2   :  { %s2050_s11 = smov 0   ;;  %s2052_s12 = smov 0  }
   0x3 LB: > { %s2067_s13 = sadd.s32 4294967295, %s1990_s12   ;;  %s1519_s14 = sadd.s32 4294967294, %s1990_s12   ;;  %s1990_s12 = sphi %s2052_s12, %s2469_s12   ;;  %s1986_s11 = sphi %s2050_s11, %s2468_s11   ;;  %s1982_s10 = sphi %s2048_s10, %s2467_s10   ;;  %s1978_s30 = sphi %s2046_s30, %s2466_s30  }
   0x4   : > { %s2071_s15 = sadd.s32 1, %s1990_s12   ;;  %s223_s16 = sadd.s32 1, %s1986_s11 }
   0x5   : > { %s220_s17 = ssub.s32 %s1990_s12, %s2071_s15  ;;  %p233_p0 = scmp.ne.s32.totalorder %s1986_s11, %s1982_s10 }
   0x6   : > { %p221_p1 = scmp.eq.s32.totalorder %s220_s17, 0  ;;  %p234_p2 = scmp.eq.s32.totalorder %s2067_s13, 1 }
   0x7   : > { %p239_p3 = scmp.ne.s32.totalorder %s1982_s10, %s1978_s30  ;;  %p240_p4 = scmp.eq.s32.totalorder %s1519_s14, 1 }
   0x8   : > { %s2082_s18 = scalar_select %p221_p1, %s1986_s11, %s223_s16  }
   0x9   : > { %p2084_p5 = por %p234_p2, %p233_p0  ;;  %p2088_p6 = por %p240_p4, %p239_p3 }
   0xa   : > { %p1522_p7 = scmp.ge.s32.totalorder %s1990_s12, 1  ;;  %p291_p8 = scmp.lt.s32.totalorder %s1990_s12, 3 }
   0xc   : > { %p292_p9 = pnand %p1522_p7, %p291_p8 }
   0xd   : > { %s327_s23 = smul.u32 (!%p292_p9), 19, %s2067_s13  ;;  %s324_s17 = sand.u32 (!%p292_p9), 1, %s1982_s10  }
   0xe   : > { %295 = sbr.rel (%p292_p9) target bundleno = 964 (0x3c4), region = 56  ;;  %s2414_s28 = scalar_lea.sflag (!%p292_p9), [#allocation3], %s324_s17 }
   0xf   : > { %p328_p10 = scmp.lt.s32.totalorder (!%p292_p9), %s327_s23, 37  ;;  %s1762_s21 = smul.u32 (!%p292_p9), 152, %s324_s17 }
  0x11   : > { %s2373_s22 = scalar_lea.vmem (!%p292_p9), [#allocation2], %s1762_s21 }
  0x13   : > { %v1805_v0 = vld [vmem:[%s2455_s1] sm:$0x1f]   ;;  %vm409_vm0 = vcmask 1044480   ;;  %v1806_v1 = vld [vmem:[%s2457_s3 + $0x38] sm:$0xff]   ;;  %v1807_v3 = vld [vmem:[%s2457_s3 + $0x30] sm:$0xff]   ;;  %s2471_s23 = smov (!%p328_p10, %s327_s23), 37 }
  0x14   : > { %1761 = vmatprep.subr.msk.bf16.mxu0 %vm409_vm0, %v1805_v0  ;;  %v411_v2 = vsel %vm409_vm0, %v1805_v0, 0  ;;  %1709 = vmatprep.subr.bf16.mxu1 %v1806_v1  ;;  %v1808_v4 = vld [vmem:[%s2457_s3 + $0x28] sm:$0xff]   ;;  %s1523_s14 = sshll.u32 %s2471_s23, 3  ;;  %v1809_v5 = vld [vmem:[%s2457_s3 + $0x20] sm:$0xff]   ;;  %vm378_vm1 = vcmask 80896   ;;  %v1810_v15 = vld [vmem:[%s2457_s3 + $0x18] sm:$0xff]  }
  0x15   : > { %1688 = vmatpush3.bf16.msra.mxu0 %v411_v2  ;;  %1710 = vmatpush3.bf16.msra.mxu1 %v1806_v1  ;;  %s2113_s24 = scalar_lea.vmem %s2454_s0, %s1523_s14  ;;  %v1811_v36 = vld [vmem:[%s2457_s3 + $0x10] sm:$0xff]   ;;  %v1812_v37 = vld [vmem:[%s2457_s3 + $0x8] sm:$0xff]   ;;  %v1813_v38 = vld [vmem:[%s2457_s3] sm:$0xff]   ;;  %s1457_s23 = sshll.u32 %s2373_s22, 4  ;;  %s2409_s23 = int_to_ptr.vmem [resolvable:$true] %s1457_s23 }
  0x16   : > { %1711 = vmatprep.subr.bf16.mxu1 %v1807_v3  ;;  %v335_v6 = vld [vmem:[%s2113_s24] sm:$0xff]  ;;  %v336_v7 = vld [vmem:[%s2113_s24 + $0x8] sm:$0xff]  ;;  %v337_v8 = vld [vmem:[%s2113_s24 + $0x10] sm:$0xff]  ;;  %s1930_s29 = scalar_lea.vmem %s2409_s23, 2432 }
  0x17   : > { %v354_v9 = vpack.c.bf16 %v336_v7, %v335_v6  ;;  %v338_v10 = vld [vmem:[%s2113_s24 + $0x18] sm:$0xff]  ;;  %v339_v11 = vld [vmem:[%s2113_s24 + $0x20] sm:$0xff]  ;;  %v340_v12 = vld [vmem:[%s2113_s24 + $0x28] sm:$0xff]  ;;  %p1931_p11 = scmp.ne.s32.totalorder %s2409_s23, %s1930_s29 }
  0x18   : > { %v355_v13 = vpack.c.bf16 %v338_v10, %v337_v8  ;;  %v356_v14 = vpack.c.bf16 %v340_v12, %v339_v11  ;;  %v341_v16 = vld [vmem:[%s2113_s24 + $0x30] sm:$0xff]  ;;  %v342_v17 = vld [vmem:[%s2113_s24 + $0x38] sm:$0xff]  ;;  %v343_v18 = vld [vmem:[%s2113_s24 + $0x40] sm:$0xff] }
  0x19   : > { %1712 = vmatpush3.bf16.msra.mxu1 %v1807_v3  ;;  %1689 = vmatprep.mubr.msk.bf16.mxu0 %vm378_vm1, %v354_v9  ;;  %v344_v19 = vld [vmem:[%s2113_s24 + $0x48] sm:$0xff]  ;;  %v357_v20 = vpack.c.bf16 %v342_v17, %v341_v16  ;;  %v345_v22 = vld [vmem:[%s2113_s24 + $0x50] sm:$0xff]  ;;  %v346_v23 = vld [vmem:[%s2113_s24 + $0x58] sm:$0xff]  ;;  %p1932_p12 = pnand %p1931_p11, %p2084_p5 }
  0x1a   : > { %1713 = vmatprep.subr.bf16.mxu1 %v1808_v4  ;;  %1690 = vmatmul.mubr.msk.bf16.vlgmr.msra.gmra.mxu0 %vm378_vm1, %v355_v13  ;;  %v358_v21 = vpack.c.bf16 %v344_v19, %v343_v18  ;;  %v347_v24 = vld [vmem:[%s2113_s24 + $0x60] sm:$0xff]  ;;  %v348_v25 = vld [vmem:[%s2113_s24 + $0x68] sm:$0xff]  ;;  %v359_v26 = vpack.c.bf16 %v346_v23, %v345_v22  ;;  %v349_v28 = vld [vmem:[%s2113_s24 + $0x70] sm:$0xff] }
  0x1b   : > { %1693 = vmatprep.mubr.msk.bf16.mxu0 %vm378_vm1, %v356_v14  ;;  %v360_v27 = vpack.c.bf16 %v348_v25, %v347_v24  ;;  %v350_v29 = vld [vmem:[%s2113_s24 + $0x78] sm:$0xff]  ;;  %v351_v30 = vld [vmem:[%s2113_s24 + $0x80] sm:$0xff]  ;;  %v352_v31 = vld [vmem:[%s2113_s24 + $0x88] sm:$0xff]  ;;  %p1933_p13 = pneg %p1932_p12 }
  0x1c   : > { %v361_v32 = vpack.c.bf16 %v350_v29, %v349_v28  ;;  %v362_v33 = vpack.c.bf16 %v352_v31, %v351_v30  ;;  %v353_v34 = vld [vmem:[%s2113_s24 + $0x90] sm:$0xff]  ;;  %v1819_v41 = vld [vmem:[%s2459_s5 + $0x64] ss:$8 sps:$4 sm:$0xff]   ;;  %v1817_v42 = vld [vmem:[%s2459_s5 + $0x60] ss:$8 sps:$4 sm:$0xff]   ;;  %s1581_s24 = smul.u32 2432, %s2067_s13 }
  0x1d   : > { %1714 = vmatpush3.bf16.msra.mxu1 %v1808_v4  ;;  %v363_v35 = vpack.c.bf16 %v353_v34, %v353_v34  ;;  %v1814_v39 = vld [vmem:[%s2459_s5 + $0x70] ss:$8 sps:$4 sm:$0xff]   ;;  %v1816_v40 = vld [vmem:[%s2459_s5 + $0x74] ss:$8 sps:$4 sm:$0xff]   ;;  %v1825_v45 = vld [vmem:[%s2459_s5 + $0x44] ss:$8 sps:$4 sm:$0xff]  }
  0x1e   : > { %1715 = vmatprep.subr.bf16.mxu1 %v1809_v5  ;;  %874 = vmatprep.subr.bf16.mxu0 %v1816_v40  ;;  %v1822_v43 = vld [vmem:[%s2459_s5 + $0x54] ss:$8 sps:$4 sm:$0xff]   ;;  %v1820_v44 = vld [vmem:[%s2459_s5 + $0x50] ss:$8 sps:$4 sm:$0xff]   ;;  %v1823_v46 = vld [vmem:[%s2459_s5 + $0x40] ss:$8 sps:$4 sm:$0xff]   ;;  %s2407_s27 = scalar_lea.hbm %s2463_s9, %s1581_s24 }
  0x1f   : > { %875 = vmatpush1.bf16.msra.mxu0 %v1814_v39  ;;  %v1828_v47 = vld [vmem:[%s2459_s5 + $0x34] ss:$8 sps:$4 sm:$0xff]   ;;  %v1826_v48 = vld [vmem:[%s2459_s5 + $0x30] ss:$8 sps:$4 sm:$0xff]   ;;  %v1831_v49 = vld [vmem:[%s2459_s5 + $0x24] ss:$8 sps:$4 sm:$0xff]  }
  0x20   : > { %876 = vmatprep.subr.bf16.mxu0 %v1819_v41  ;;  %v1829_v50 = vld [vmem:[%s2459_s5 + $0x20] ss:$8 sps:$4 sm:$0xff]   ;;  %s1993_s13 = smov [#allocation2]  }
  0x21   : > { %1716 = vmatpush3.bf16.msra.mxu1 %v1809_v5  ;;  %v2195_v53 = vld [vmem:[%s2456_s2] ss:$0 sm:$0xff]  ;;  %s1934_s14 = sshll.u32 %s1993_s13, 4  ;;  %s1935_s14 = int_to_ptr.vmem [resolvable:$false] %s1934_s14 }
  0x22   : > { %1717 = vmatprep.subr.bf16.mxu1 %v1810_v15  ;;  %1694 = vmatmul.mubr.msk.bf16.gmra.mxu0 %vm378_vm1, %v357_v20  ;;  %s1936_s16 = scalar_lea.vmem %s1935_s14, 4864  ;;  %p1937_p0 = scmp.lt.s32.totalorder %s2409_s23, %s1935_s14 }
  0x23   : > { %1697 = vmatprep.mubr.msk.bf16.mxu0 %vm378_vm1, %v358_v21  ;;  %877 = vmatpush1.bf16.msra.mxu0 %v1817_v42  ;;  %p1938_p1 = scmp.lt.s32.totalorder %s1936_s16, %s1930_s29 }
  0x24   : > { %878 = vmatprep.subr.bf16.mxu0 %v1822_v43 }
  0x25   : > { %1718 = vmatpush3.bf16.msra.mxu1 %v1810_v15  ;;  %p1939_p2 = por %p1938_p1, %p1937_p0 }
  0x26   : > { %1719 = vmatprep.subr.bf16.mxu1 %v1811_v36 }
  0x27   : > { %879 = vmatpush1.bf16.msra.mxu0 %v1820_v44  ;;  %p1940_p3 = pnand %p1939_p2, %p1933_p13 }
  0x28   : > { %880 = vmatprep.subr.bf16.mxu0 %v1825_v45 }
  0x29   : > { %1720 = vmatpush3.bf16.msra.mxu1 %v1811_v36 }
  0x2a   : > { %1698 = vmatmul.mubr.msk.bf16.gmra.mxu0 %vm378_vm1, %v359_v26  ;;  %1721 = vmatprep.subr.bf16.mxu1 %v1812_v37 }
  0x2b   : > { %1701 = vmatprep.mubr.msk.bf16.mxu0 %vm378_vm1, %v360_v27  ;;  %881 = vmatpush1.bf16.msra.mxu0 %v1823_v46 }
  0x2c   : > { %882 = vmatprep.subr.bf16.mxu0 %v1828_v47 }
  0x2d   : > { %1722 = vmatpush3.bf16.msra.mxu1 %v1812_v37 }
  0x2e   : > { %1723 = vmatprep.subr.bf16.mxu1 %v1813_v38 }
  0x2f   : > { %883 = vmatpush1.bf16.msra.mxu0 %v1826_v48 }
  0x30   : > { %884 = vmatprep.subr.bf16.mxu0 %v1831_v49 }
  0x31   : > { %1724 = vmatpush3.bf16.msra.mxu1 %v1813_v38 }
  0x32   : > { %1702 = vmatmul.mubr.msk.bf16.gmra.mxu0 %vm378_vm1, %v361_v32 }
  0x33   : > { %1705 = vmatprep.mubr.msk.bf16.mxu0 %vm378_vm1, %v362_v33  ;;  %885 = vmatpush1.bf16.msra.mxu0 %v1829_v50 }
  0x3a   : > { %1706 = vmatmul.mubr.msk.bf16.gmra.mxu0 %vm378_vm1, %v363_v35 }
  0xda   : > { %v1691_v51 = vpop.f32.mrf.mxu0 }
  0xdb   : > { %v456_v57 = vadd.f32 %v1691_v51, %v2195_v53 }
  0xdc   : > { %v447_v52 = vpop.f32.mrf.mxu0 }
  0xdd   : > { %v448_v55 = vadd.f32 %v2195_v53, %v447_v52  ;;  %v527_v0 = vmax.f32 %v456_v57, 0.0  ;;  %v1834_v57 = vld [vmem:[%s2459_s5 + $0x14] ss:$8 sps:$4 sm:$0xff]  }
  0xde   : > { %v1692_v54 = vpop.f32.mrf.mxu0  ;;  %886 = vmatprep.subr.bf16.mxu0 %v1834_v57 }
  0xdf   : > { %v459_v56 = vadd.f32 %v1692_v54, %v2195_v53  ;;  %v525_v62 = vmax.f32 %v448_v55, 0.0 }
  0xe0   : > { %v450_v58 = vpop.f32.mrf.mxu0 }
  0xe1   : > { %v451_v59 = vadd.f32 %v2195_v53, %v450_v58  ;;  %v528_v60 = vmax.f32 %v459_v56, 0.0  ;;  %v1832_v58 = vld [vmem:[%s2459_s5 + $0x10] ss:$8 sps:$4 sm:$0xff]  }
  0xe2   : > { %v1695_v61 = vpop.f32.mrf.mxu0  ;;  %887 = vmatpush1.bf16.msra.mxu0 %v1832_v58 }
  0xe3   : > { %v526_v63 = vmax.f32 %v451_v59, 0.0  ;;  %v472_v1 = vadd.f32 %v1695_v61, %v2195_v53  ;;  %v545_v5 = vpack.c.bf16 %v528_v60, %v527_v0  ;;  %v1837_v59 = vld [vmem:[%s2459_s5 + $0x4] ss:$8 sps:$4 sm:$0xff]   ;;  %v1992_v60 = vmov 0   ;;  %v1838_v61 = vld [vmem:[%s2461_s7 + $0x78] sm:$0xff]   ;;  %v1841_v0 = vld [vmem:[%s2461_s7 + $0x30] sm:$0xff]  }
  0xe4   : > { %v463_v2 = vpop.f32.mrf.mxu0  ;;  %888 = vmatprep.subr.bf16.mxu0 %v1837_v59  ;;  %906 = vmatprep.mubr.bf16.mxu0 %v1992_v60 }
  0xe5   : > { %v464_v3 = vadd.f32 %v2195_v53, %v463_v2  ;;  %v544_v4 = vpack.c.bf16 %v526_v63, %v525_v62  ;;  %v531_v8 = vmax.f32 %v472_v1, 0.0  ;;  %v1839_v62 = vld [vmem:[%s2461_s7 + $0x38] sm:$0xff]   ;;  %1745 = vmatprep.subr.bf16.mxu1 %v1838_v61  ;;  %v1840_v63 = vld [vmem:[%s2461_s7 + $0x70] sm:$0xff]   ;;  %v1842_v1 = vld [vmem:[%s2461_s7 + $0x68] sm:$0xff]  }
  0xe6   : > { %v1696_v6 = vpop.f32.mrf.mxu0  ;;  %v1843_v2 = vld [vmem:[%s2461_s7 + $0x28] sm:$0xff]  }
  0xe7   : > { %v475_v7 = vadd.f32 %v1696_v6, %v2195_v53  ;;  %1725 = vmatprep.mubr.bf16.mxu1 %v544_v4  ;;  %v529_v10 = vmax.f32 %v464_v3, 0.0  ;;  %v1844_v3 = vld [vmem:[%s2461_s7 + $0x60] sm:$0xff]   ;;  %v1847_v6 = vld [vmem:[%s2461_s7 + $0x18] sm:$0xff]  }
  0xe8   : > { %v466_v9 = vpop.f32.mrf.mxu0  ;;  %1726 = vmatmul.mubr.bf16.vlgmr.msra.gmra.mxu1 %v545_v5  ;;  %v1845_v4 = vld [vmem:[%s2461_s7 + $0x20] sm:$0xff]   ;;  %v1846_v5 = vld [vmem:[%s2461_s7 + $0x58] sm:$0xff]  }
  0xe9   : > { %v532_v11 = vmax.f32 %v475_v7, 0.0  ;;  %v467_v12 = vadd.f32 %v2195_v53, %v466_v9  ;;  %1753 = vmatpush3.bf16.msra.mxu1 %v1839_v62  ;;  %v2262_v9 = vld [vmem:[%s2458_s4] ss:$0 sm:$0xff] }
  0xea   : > { %v1699_v13 = vpop.f32.mrf.mxu0  ;;  %1746 = vmatprep.subr.bf16.mxu1 %v1840_v63 }
  0xeb   : > { %v530_v14 = vmax.f32 %v467_v12, 0.0  ;;  %v547_v15 = vpack.c.bf16 %v532_v11, %v531_v8  ;;  %v488_v16 = vadd.f32 %v1699_v13, %v2195_v53 }
  0xec   : > { %v479_v17 = vpop.f32.mrf.mxu0 }
  0xed   : > { %v546_v18 = vpack.c.bf16 %v530_v14, %v529_v10  ;;  %v480_v19 = vadd.f32 %v2195_v53, %v479_v17  ;;  %v535_v22 = vmax.f32 %v488_v16, 0.0  ;;  %1754 = vmatpush3.bf16.msra.mxu1 %v1841_v0 }
  0xee   : > { %v1700_v20 = vpop.f32.mrf.mxu0  ;;  %1747 = vmatprep.subr.bf16.mxu1 %v1842_v1 }
  0xef   : > { %1729 = vmatprep.mubr.bf16.mxu1 %v546_v18  ;;  %v491_v21 = vadd.f32 %v1700_v20, %v2195_v53  ;;  %v533_v24 = vmax.f32 %v480_v19, 0.0 }
  0xf0   : > { %1730 = vmatmul.mubr.bf16.gmra.mxu1 %v547_v15  ;;  %v482_v23 = vpop.f32.mrf.mxu0 }
  0xf1   : > { %v536_v25 = vmax.f32 %v491_v21, 0.0  ;;  %v483_v26 = vadd.f32 %v2195_v53, %v482_v23  ;;  %1755 = vmatpush3.bf16.msra.mxu1 %v1843_v2 }
  0xf2   : > { %v1703_v27 = vpop.f32.mrf.mxu0  ;;  %1748 = vmatprep.subr.bf16.mxu1 %v1844_v3 }
  0xf3   : > { %v534_v28 = vmax.f32 %v483_v26, 0.0  ;;  %v549_v29 = vpack.c.bf16 %v536_v25, %v535_v22  ;;  %v504_v30 = vadd.f32 %v1703_v27, %v2195_v53 }
  0xf4   : > { %v495_v31 = vpop.f32.mrf.mxu0 }
  0xf5   : > { %v548_v32 = vpack.c.bf16 %v534_v28, %v533_v24  ;;  %v496_v33 = vadd.f32 %v2195_v53, %v495_v31  ;;  %v539_v36 = vmax.f32 %v504_v30, 0.0  ;;  %1756 = vmatpush3.bf16.msra.mxu1 %v1845_v4 }
  0xf6   : > { %v1704_v34 = vpop.f32.mrf.mxu0  ;;  %1749 = vmatprep.subr.bf16.mxu1 %v1846_v5 }
  0xf7   : > { %1733 = vmatprep.mubr.bf16.mxu1 %v548_v32  ;;  %v507_v35 = vadd.f32 %v1704_v34, %v2195_v53  ;;  %v537_v38 = vmax.f32 %v496_v33, 0.0 }
  0xf8   : > { %1734 = vmatmul.mubr.bf16.gmra.mxu1 %v549_v29  ;;  %v498_v37 = vpop.f32.mrf.mxu0 }
  0xf9   : > { %v540_v39 = vmax.f32 %v507_v35, 0.0  ;;  %v499_v40 = vadd.f32 %v2195_v53, %v498_v37  ;;  %1757 = vmatpush3.bf16.msra.mxu1 %v1847_v6 }
  0xfa   : > { %v1707_v41 = vpop.f32.mrf.mxu0 }
  0xfb   : > { %v538_v42 = vmax.f32 %v499_v40, 0.0  ;;  %v551_v43 = vpack.c.bf16 %v540_v39, %v539_v36  ;;  %v520_v44 = vadd.f32 %v1707_v41, %v2195_v53 }
  0xfc   : > { %v511_v45 = vpop.f32.mrf.mxu0 }
  0xfd   : > { %v550_v46 = vpack.c.bf16 %v538_v42, %v537_v38  ;;  %v512_v47 = vadd.f32 %v2195_v53, %v511_v45  ;;  %v543_v49 = vmax.f32 %v520_v44, 0.0 }
  0xfe   : > { %v1708_v48 = vpop.f32.mrf.mxu0 }
  0xff   : > { %1737 = vmatprep.mubr.bf16.mxu1 %v550_v46  ;;  %v541_v51 = vmax.f32 %v512_v47, 0.0  ;;  %v553_v55 = vpack.c.bf16 %v543_v49, %v543_v49 }
 0x100   : > { %1738 = vmatmul.mubr.bf16.gmra.mxu1 %v551_v43  ;;  %v514_v50 = vpop.f32.mrf.mxu0 }
 0x101   : > { %v515_v52 = vadd.f32 %v2195_v53, %v514_v50  ;;  %v1835_v53 = vld [vmem:[%s2459_s5] ss:$8 sps:$4 sm:$0xff]  }
 0x102   : > { %889 = vmatpush1.bf16.msra.mxu0 %v1835_v53 }
 0x103   : > { %v542_v54 = vmax.f32 %v515_v52, 0.0  ;;  %1611 = vmatprep.subr.bf16.mxu0 %v1838_v61 }
 0x105   : > { %v552_v56 = vpack.c.bf16 %v542_v54, %v541_v51 }
 0x107   : > { %1741 = vmatprep.mubr.bf16.mxu1 %v552_v56 }
 0x108   : > { %1742 = vmatmul.mubr.bf16.gmra.mxu1 %v553_v55 }
 0x1a8   : > { %v1727_v7 = vpop.f32.mrf.mxu1 }
 0x1a9   : > { %v668_v21 = vadd.f32 %v1727_v7, %v2262_v9 }
 0x1aa   : > { %v659_v8 = vpop.f32.mrf.mxu1 }
 0x1ab   : > { %v660_v11 = vadd.f32 %v2262_v9, %v659_v8  ;;  %v739_v25 = vmax.f32 %v668_v21, 0.0 }
 0x1ac   : > { %v1728_v10 = vpop.f32.mrf.mxu1 }
 0x1ad   : > { %v737_v15 = vmax.f32 %v660_v11, 0.0  ;;  %v671_v18 = vadd.f32 %v1728_v10, %v2262_v9 }
 0x1ae   : > { %v662_v12 = vpop.f32.mrf.mxu1 }
 0x1af   : > { %v663_v13 = vadd.f32 %v2262_v9, %v662_v12  ;;  %v740_v23 = vmax.f32 %v671_v18, 0.0  ;;  %v1848_v12 = vld [vmem:[%s2461_s7 + $0x50] sm:$0xff]   ;;  %v784_v18 = vlaneseq }
 0x1b0   : > { %v1731_v14 = vpop.f32.mrf.mxu1  ;;  %1750 = vmatprep.subr.bf16.mxu1 %v1848_v12 }
 0x1b1   : > { %v738_v16 = vmax.f32 %v663_v13, 0.0  ;;  %v757_v27 = vpack.c.bf16 %v740_v23, %v739_v25  ;;  %v684_v39 = vadd.f32 %v1731_v14, %v2262_v9  ;;  %v1849_v13 = vld [vmem:[%s2461_s7 + $0x10] sm:$0xff]  }
 0x1b2   : > { %v675_v17 = vpop.f32.mrf.mxu1  ;;  %1758 = vmatpush3.bf16.msra.mxu1 %v1849_v13 }
 0x1b3   : > { %v756_v19 = vpack.c.bf16 %v738_v16, %v737_v15  ;;  %v676_v30 = vadd.f32 %v2262_v9, %v675_v17  ;;  %v743_v43 = vmax.f32 %v684_v39, 0.0  ;;  %v1851_v15 = vld [vmem:[%s2461_s7 + $0x8] sm:$0xff]   ;;  %v1853_v17 = vld [vmem:[%s2461_s7] sm:$0xff]  }
 0x1b4   : > { %v1732_v20 = vpop.f32.mrf.mxu1 }
 0x1b5   : > { %907 = vmatmul.mubr.bf16.vlgmr.msra.gmra.mxu0 %v756_v19  ;;  %v741_v34 = vmax.f32 %v676_v30, 0.0  ;;  %v687_v36 = vadd.f32 %v1732_v20, %v2262_v9  ;;  %v785_v19 = vshrl.u32 %v784_v18, 7 }
 0x1b6   : > { %v678_v22 = vpop.f32.mrf.mxu1  ;;  %916 = vmatprep.mubr.bf16.mxu0 %v1992_v60  ;;  %1612 = vmatpush3.bf16.msra.mxu0 %v1839_v62 }
 0x1b7   : > { %1613 = vmatprep.subr.bf16.mxu0 %v1840_v63  ;;  %v679_v28 = vadd.f32 %v2262_v9, %v678_v22  ;;  %v744_v41 = vmax.f32 %v687_v36, 0.0  ;;  %v790_v20 = vsub.s32 1, %v785_v19  ;;  %v786_v21 = vsub.s32 0, %v785_v19  ;;  %v782_v22 = vld [vmem:[%s2460_s6] sm:$0x3] }
 0x1b8   : > { %v1735_v24 = vpop.f32.mrf.mxu1 }
 0x1b9   : > { %v742_v32 = vmax.f32 %v679_v28, 0.0  ;;  %v759_v45 = vpack.c.bf16 %v744_v41, %v743_v43  ;;  %v700_v51 = vadd.f32 %v1735_v24, %v2262_v9  ;;  %v2313_v24 = vrot.slane %v782_v22, %v790_v20 }
 0x1ba   : > { %v691_v26 = vpop.f32.mrf.mxu1  ;;  %1614 = vmatpush3.bf16.msra.mxu0 %v1841_v0  ;;  %v2315_v25 = vrot.slane %v782_v22, %v786_v21 }
 0x1bb   : > { %1615 = vmatprep.subr.bf16.mxu0 %v1842_v1  ;;  %v758_v37 = vpack.c.bf16 %v742_v32, %v741_v34  ;;  %v692_v46 = vadd.f32 %v2262_v9, %v691_v26  ;;  %v747_v55 = vmax.f32 %v700_v51, 0.0 }
 0x1bc   : > { %v1736_v29 = vpop.f32.mrf.mxu1 }
 0x1bd   : > { %917 = vmatmul.mubr.bf16.gmra.mxu0 %v757_v27  ;;  %v745_v49 = vmax.f32 %v692_v46, 0.0  ;;  %v703_v52 = vadd.f32 %v1736_v29, %v2262_v9 }
 0x1be   : > { %v694_v31 = vpop.f32.mrf.mxu1  ;;  %926 = vmatprep.mubr.bf16.mxu0 %v1992_v60  ;;  %1616 = vmatpush3.bf16.msra.mxu0 %v1843_v2 }
 0x1bf   : > { %1617 = vmatprep.subr.bf16.mxu0 %v1844_v3  ;;  %v695_v47 = vadd.f32 %v2262_v9, %v694_v31  ;;  %v748_v56 = vmax.f32 %v703_v52, 0.0 }
 0x1c0   : > { %v1739_v33 = vpop.f32.mrf.mxu1 }
 0x1c1   : > { %v746_v50 = vmax.f32 %v695_v47, 0.0  ;;  %v761_v57 = vpack.c.bf16 %v748_v56, %v747_v55  ;;  %v716_v62 = vadd.f32 %v1739_v33, %v2262_v9 }
 0x1c2   : > { %v707_v35 = vpop.f32.mrf.mxu1  ;;  %1618 = vmatpush3.bf16.msra.mxu0 %v1845_v4 }
 0x1c3   : > { %1619 = vmatprep.subr.bf16.mxu0 %v1846_v5  ;;  %v760_v54 = vpack.c.bf16 %v746_v50, %v745_v49  ;;  %v708_v58 = vadd.f32 %v2262_v9, %v707_v35  ;;  %v751_v1 = vmax.f32 %v716_v62, 0.0 }
 0x1c4   : > { %v1740_v38 = vpop.f32.mrf.mxu1 }
 0x1c5   : > { %927 = vmatmul.mubr.bf16.gmra.mxu0 %v758_v37  ;;  %v749_v53 = vmax.f32 %v708_v58, 0.0  ;;  %v719_v63 = vadd.f32 %v1740_v38, %v2262_v9 }
 0x1c6   : > { %936 = vmatprep.mubr.bf16.mxu0 %v1992_v60  ;;  %v710_v40 = vpop.f32.mrf.mxu1  ;;  %1620 = vmatpush3.bf16.msra.mxu0 %v1847_v6 }
 0x1c7   : > { %v711_v59 = vadd.f32 %v2262_v9, %v710_v40  ;;  %v752_v2 = vmax.f32 %v719_v63, 0.0  ;;  %1621 = vmatprep.subr.bf16.mxu0 %v1848_v12 }
 0x1c8   : > { %v1743_v42 = vpop.f32.mrf.mxu1 }
 0x1c9   : > { %v750_v61 = vmax.f32 %v711_v59, 0.0  ;;  %v763_v4 = vpack.c.bf16 %v752_v2, %v751_v1  ;;  %v732_v10 = vadd.f32 %v1743_v42, %v2262_v9 }
 0x1ca   : > { %v723_v44 = vpop.f32.mrf.mxu1  ;;  %1622 = vmatpush3.bf16.msra.mxu0 %v1849_v13 }
 0x1cb   : > { %v762_v0 = vpack.c.bf16 %v750_v61, %v749_v53  ;;  %v724_v5 = vadd.f32 %v2262_v9, %v723_v44  ;;  %v755_v14 = vmax.f32 %v732_v10, 0.0 }
 0x1cc   : > { %v1744_v48 = vpop.f32.mrf.mxu1 }
 0x1cd   : > { %937 = vmatmul.mubr.bf16.gmra.mxu0 %v759_v45  ;;  %v753_v7 = vmax.f32 %v724_v5, 0.0  ;;  %v765_v16 = vpack.c.bf16 %v755_v14, %v755_v14 }
 0x1ce   : > { %946 = vmatprep.mubr.bf16.mxu0 %v1992_v60  ;;  %v726_v3 = vpop.f32.mrf.mxu1 }
 0x1cf   : > { %v727_v6 = vadd.f32 %v2262_v9, %v726_v3  ;;  %v1850_v9 = vld [vmem:[%s2461_s7 + $0x48] sm:$0xff]  }
 0x1d0   : > { %1623 = vmatprep.subr.bf16.mxu0 %v1850_v9  ;;  %1751 = vmatprep.subr.bf16.mxu1 %v1850_v9 }
 0x1d1   : > { %v754_v8 = vmax.f32 %v727_v6, 0.0  ;;  %1624 = vmatpush3.bf16.msra.mxu0 %v1851_v15  ;;  %1759 = vmatpush3.bf16.msra.mxu1 %v1851_v15 }
 0x1d3   : > { %v764_v11 = vpack.c.bf16 %v754_v8, %v753_v7 }
 0x1d5   : > { %947 = vmatmul.mubr.bf16.gmra.mxu0 %v760_v54 }
 0x1d6   : > { %956 = vmatprep.mubr.bf16.mxu0 %v1992_v60 }
 0x1dd   : > { %957 = vmatmul.mubr.bf16.gmra.mxu0 %v761_v57 }
 0x1de   : > { %966 = vmatprep.mubr.bf16.mxu0 %v1992_v60 }
 0x1e5   : > { %967 = vmatmul.mubr.bf16.gmra.mxu0 %v762_v0 }
 0x1e6   : > { %976 = vmatprep.mubr.bf16.mxu0 %v1992_v60 }
 0x1ed   : > { %977 = vmatmul.mubr.bf16.gmra.mxu0 %v763_v4 }
 0x1ee   : > { %986 = vmatprep.mubr.bf16.mxu0 %v1992_v60 }
 0x1f5   : > { %987 = vmatmul.mubr.bf16.gmra.mxu0 %v764_v11 }
 0x1f6   : > { %996 = vmatprep.mubr.bf16.mxu0 %v1992_v60  ;;  %v1852_v60 = vld [vmem:[%s2461_s7 + $0x40] sm:$0xff]  }
 0x1f7   : > { %1625 = vmatprep.subr.bf16.mxu0 %v1852_v60  ;;  %1752 = vmatprep.subr.bf16.mxu1 %v1852_v60 }
 0x1f8   : > { %1626 = vmatpush3.bf16.msra.mxu0 %v1853_v17  ;;  %1760 = vmatpush3.bf16.msra.mxu1 %v1853_v17 }
 0x1fd   : > { %997 = vmatmul.mubr.bf16.gmra.mxu0 %v765_v16 }
 0x275   : > { %v908_v23 = vpop.f32.mrf.mxu0 }
 0x276   : > { %v909_v30 = vadd.f32 %v908_v23, %v2315_v25 }
 0x277   : > { %v910_v26 = vpop.f32.mrf.mxu0 }
 0x278   : > { %v911_v28 = vadd.f32 %v910_v26, %v2313_v24  ;;  %v1005_v37 = vmax.f32 %v909_v30, 0.0 }
 0x279   : > { %v912_v27 = vpop.f32.mrf.mxu0 }
 0x27a   : > { %v913_v29 = vadd.f32 %v912_v27, %v2315_v25  ;;  %v1006_v35 = vmax.f32 %v911_v28, 0.0 }
 0x27b   : > { %v914_v31 = vpop.f32.mrf.mxu0 }
 0x27c   : > { %v915_v32 = vadd.f32 %v914_v31, %v2313_v24  ;;  %v1007_v33 = vmax.f32 %v913_v29, 0.0 }
 0x27d   : > { %v918_v34 = vpop.f32.mrf.mxu0 }
 0x27e   : > { %v1008_v36 = vmax.f32 %v915_v32, 0.0  ;;  %v1043_v40 = vpack.c.bf16 %v1007_v33, %v1005_v37  ;;  %v919_v44 = vadd.f32 %v918_v34, %v2315_v25 }
 0x27f   : > { %v920_v38 = vpop.f32.mrf.mxu0 }
 0x280   : > { %v1044_v39 = vpack.c.bf16 %v1008_v36, %v1006_v35  ;;  %v921_v42 = vadd.f32 %v920_v38, %v2313_v24  ;;  %v1009_v51 = vmax.f32 %v919_v44, 0.0 }
 0x281   : > { %v922_v41 = vpop.f32.mrf.mxu0 }
 0x282   : > { %v923_v43 = vadd.f32 %v922_v41, %v2315_v25  ;;  %1230 = vmatprep.mubr.bf16.mxu0 %v1044_v39  ;;  %v1010_v49 = vmax.f32 %v921_v42, 0.0 }
 0x283   : > { %v924_v45 = vpop.f32.mrf.mxu0  ;;  %1231 = vmatmul.mubr.bf16.vlgmr.msra.gmra.mxu0 %v1043_v40 }
 0x284   : > { %v925_v46 = vadd.f32 %v924_v45, %v2313_v24  ;;  %v1011_v47 = vmax.f32 %v923_v43, 0.0 }
 0x285   : > { %v928_v48 = vpop.f32.mrf.mxu0 }
 0x286   : > { %v1012_v50 = vmax.f32 %v925_v46, 0.0  ;;  %v1045_v55 = vpack.c.bf16 %v1011_v47, %v1009_v51  ;;  %v929_v59 = vadd.f32 %v928_v48, %v2315_v25 }
 0x287   : > { %v930_v52 = vpop.f32.mrf.mxu0 }
 0x288   : > { %v1046_v54 = vpack.c.bf16 %v1012_v50, %v1010_v49  ;;  %v931_v57 = vadd.f32 %v930_v52, %v2313_v24  ;;  %v1013_v2 = vmax.f32 %v929_v59, 0.0 }
 0x289   : > { %v932_v56 = vpop.f32.mrf.mxu0 }
 0x28a   : > { %v933_v58 = vadd.f32 %v932_v56, %v2315_v25  ;;  %1238 = vmatprep.mubr.bf16.mxu1 %v1046_v54  ;;  %v1014_v0 = vmax.f32 %v931_v57, 0.0 }
 0x28b   : > { %v934_v53 = vpop.f32.mrf.mxu0  ;;  %1239 = vmatmul.mubr.bf16.vlgmr.msra.gmra.mxu1 %v1045_v55 }
 0x28c   : > { %v935_v61 = vadd.f32 %v934_v53, %v2313_v24  ;;  %v1015_v62 = vmax.f32 %v933_v58, 0.0 }
 0x28d   : > { %v938_v63 = vpop.f32.mrf.mxu0 }
 0x28e   : > { %v1016_v1 = vmax.f32 %v935_v61, 0.0  ;;  %v1047_v5 = vpack.c.bf16 %v1015_v62, %v1013_v2  ;;  %v939_v10 = vadd.f32 %v938_v63, %v2315_v25 }
 0x28f   : > { %v940_v3 = vpop.f32.mrf.mxu0 }
 0x290   : > { %v1048_v4 = vpack.c.bf16 %v1016_v1, %v1014_v0  ;;  %v941_v7 = vadd.f32 %v940_v3, %v2313_v24  ;;  %v1017_v16 = vmax.f32 %v939_v10, 0.0 }
 0x291   : > { %v942_v6 = vpop.f32.mrf.mxu0 }
 0x292   : > { %v943_v8 = vadd.f32 %v942_v6, %v2315_v25  ;;  %1246 = vmatprep.mubr.bf16.mxu1 %v1048_v4  ;;  %v1018_v9 = vmax.f32 %v941_v7, 0.0 }
 0x293   : > { %v944_v11 = vpop.f32.mrf.mxu0  ;;  %1247 = vmatmul.mubr.bf16.gmra.mxu1 %v1047_v5 }
 0x294   : > { %v945_v12 = vadd.f32 %v944_v11, %v2313_v24  ;;  %v1019_v13 = vmax.f32 %v943_v8, 0.0 }
 0x295   : > { %v948_v14 = vpop.f32.mrf.mxu0 }
 0x296   : > { %v1020_v15 = vmax.f32 %v945_v12, 0.0  ;;  %v1049_v18 = vpack.c.bf16 %v1019_v13, %v1017_v16  ;;  %v949_v22 = vadd.f32 %v948_v14, %v2315_v25 }
 0x297   : > { %v950_v60 = vpop.f32.mrf.mxu0 }
 0x298   : > { %v1050_v17 = vpack.c.bf16 %v1020_v15, %v1018_v9  ;;  %v951_v20 = vadd.f32 %v950_v60, %v2313_v24  ;;  %v1021_v31 = vmax.f32 %v949_v22, 0.0 }
 0x299   : > { %v952_v19 = vpop.f32.mrf.mxu0 }
 0x29a   : > { %v953_v21 = vadd.f32 %v952_v19, %v2315_v25  ;;  %1254 = vmatprep.mubr.bf16.mxu1 %v1050_v17  ;;  %v1022_v29 = vmax.f32 %v951_v20, 0.0 }
 0x29b   : > { %v954_v23 = vpop.f32.mrf.mxu0  ;;  %1255 = vmatmul.mubr.bf16.gmra.mxu1 %v1049_v18 }
 0x29c   : > { %v955_v26 = vadd.f32 %v954_v23, %v2313_v24  ;;  %v1023_v27 = vmax.f32 %v953_v21, 0.0 }
 0x29d   : > { %v958_v28 = vpop.f32.mrf.mxu0 }
 0x29e   : > { %v1024_v30 = vmax.f32 %v955_v26, 0.0  ;;  %v1051_v34 = vpack.c.bf16 %v1023_v27, %v1021_v31  ;;  %v959_v38 = vadd.f32 %v958_v28, %v2315_v25 }
 0x29f   : > { %v960_v32 = vpop.f32.mrf.mxu0 }
 0x2a0   : > { %v1052_v33 = vpack.c.bf16 %v1024_v30, %v1022_v29  ;;  %v961_v36 = vadd.f32 %v960_v32, %v2313_v24  ;;  %v1025_v45 = vmax.f32 %v959_v38, 0.0  ;;  %v2358_v38 = vld [vmem:[%s2462_s8] ss:$0 sm:$0xff] }
 0x2a1   : > { %v962_v35 = vpop.f32.mrf.mxu0 }
 0x2a2   : > { %v963_v37 = vadd.f32 %v962_v35, %v2315_v25  ;;  %1262 = vmatprep.mubr.bf16.mxu1 %v1052_v33  ;;  %v1026_v43 = vmax.f32 %v961_v36, 0.0 }
 0x2a3   : > { %v964_v39 = vpop.f32.mrf.mxu0  ;;  %1263 = vmatmul.mubr.bf16.gmra.mxu1 %v1051_v34 }
 0x2a4   : > { %v965_v40 = vadd.f32 %v964_v39, %v2313_v24  ;;  %v1027_v41 = vmax.f32 %v963_v37, 0.0 }
 0x2a5   : > { %v968_v42 = vpop.f32.mrf.mxu0 }
 0x2a6   : > { %v1028_v44 = vmax.f32 %v965_v40, 0.0  ;;  %v1053_v48 = vpack.c.bf16 %v1027_v41, %v1025_v45  ;;  %v969_v52 = vadd.f32 %v968_v42, %v2315_v25 }
 0x2a7   : > { %v970_v46 = vpop.f32.mrf.mxu0 }
 0x2a8   : > { %v1054_v47 = vpack.c.bf16 %v1028_v44, %v1026_v43  ;;  %v971_v50 = vadd.f32 %v970_v46, %v2313_v24  ;;  %v1029_v53 = vmax.f32 %v969_v52, 0.0 }
 0x2a9   : > { %v972_v49 = vpop.f32.mrf.mxu0 }
 0x2aa   : > { %v973_v51 = vadd.f32 %v972_v49, %v2315_v25  ;;  %1270 = vmatprep.mubr.bf16.mxu1 %v1054_v47  ;;  %v1030_v58 = vmax.f32 %v971_v50, 0.0 }
 0x2ab   : > { %v974_v54 = vpop.f32.mrf.mxu0  ;;  %1271 = vmatmul.mubr.bf16.gmra.mxu1 %v1053_v48 }
 0x2ac   : > { %v975_v55 = vadd.f32 %v974_v54, %v2313_v24  ;;  %v1031_v56 = vmax.f32 %v973_v51, 0.0 }
 0x2ad   : > { %v978_v57 = vpop.f32.mrf.mxu0 }
 0x2ae   : > { %v1032_v59 = vmax.f32 %v975_v55, 0.0  ;;  %v1055_v63 = vpack.c.bf16 %v1031_v56, %v1029_v53  ;;  %v979_v3 = vadd.f32 %v978_v57, %v2315_v25 }
 0x2af   : > { %v980_v61 = vpop.f32.mrf.mxu0 }
 0x2b0   : > { %v1056_v62 = vpack.c.bf16 %v1032_v59, %v1030_v58  ;;  %v981_v1 = vadd.f32 %v980_v61, %v2313_v24  ;;  %v1033_v11 = vmax.f32 %v979_v3, 0.0 }
 0x2b1   : > { %v982_v0 = vpop.f32.mrf.mxu0 }
 0x2b2   : > { %v983_v2 = vadd.f32 %v982_v0, %v2315_v25  ;;  %1278 = vmatprep.mubr.bf16.mxu1 %v1056_v62  ;;  %v1034_v8 = vmax.f32 %v981_v1, 0.0 }
 0x2b3   : > { %v984_v4 = vpop.f32.mrf.mxu0  ;;  %1279 = vmatmul.mubr.bf16.gmra.mxu1 %v1055_v63 }
 0x2b4   : > { %v985_v5 = vadd.f32 %v984_v4, %v2313_v24  ;;  %v1035_v6 = vmax.f32 %v983_v2, 0.0 }
 0x2b5   : > { %v988_v7 = vpop.f32.mrf.mxu0 }
 0x2b6   : > { %v1036_v10 = vmax.f32 %v985_v5, 0.0  ;;  %v1057_v14 = vpack.c.bf16 %v1035_v6, %v1033_v11  ;;  %v989_v60 = vadd.f32 %v988_v7, %v2315_v25 }
 0x2b7   : > { %v990_v12 = vpop.f32.mrf.mxu0 }
 0x2b8   : > { %v1058_v13 = vpack.c.bf16 %v1036_v10, %v1034_v8  ;;  %v991_v15 = vadd.f32 %v990_v12, %v2313_v24  ;;  %v1037_v23 = vmax.f32 %v989_v60, 0.0 }
 0x2b9   : > { %v992_v9 = vpop.f32.mrf.mxu0 }
 0x2ba   : > { %v993_v16 = vadd.f32 %v992_v9, %v2315_v25  ;;  %1286 = vmatprep.mubr.bf16.mxu1 %v1058_v13  ;;  %v1038_v21 = vmax.f32 %v991_v15, 0.0 }
 0x2bb   : > { %v994_v17 = vpop.f32.mrf.mxu0  ;;  %1287 = vmatmul.mubr.bf16.gmra.mxu1 %v1057_v14 }
 0x2bc   : > { %v995_v18 = vadd.f32 %v994_v17, %v2313_v24  ;;  %v1039_v19 = vmax.f32 %v993_v16, 0.0 }
 0x2bd   : > { %v998_v20 = vpop.f32.mrf.mxu0 }
 0x2be   : > { %v1040_v22 = vmax.f32 %v995_v18, 0.0  ;;  %v1059_v29 = vpack.c.bf16 %v1039_v19, %v1037_v23  ;;  %v999_v30 = vadd.f32 %v998_v20, %v2315_v25 }
 0x2bf   : > { %v1000_v26 = vpop.f32.mrf.mxu0 }
 0x2c0   : > { %v1060_v27 = vpack.c.bf16 %v1040_v22, %v1038_v21  ;;  %v1001_v28 = vadd.f32 %v1000_v26, %v2313_v24  ;;  %v1041_v35 = vmax.f32 %v999_v30, 0.0 }
 0x2c1   : > { %v1002_v31 = vpop.f32.mrf.mxu0 }
 0x2c2   : > { %v1042_v32 = vmax.f32 %v1001_v28, 0.0  ;;  %1294 = vmatprep.mubr.bf16.mxu1 %v1060_v27  ;;  %v1061_v36 = vpack.c.bf16 %v1041_v35, %v1041_v35 }
 0x2c3   : > { %v1003_v33 = vpop.f32.mrf.mxu0  ;;  %1295 = vmatmul.mubr.bf16.gmra.mxu1 %v1059_v29 }
 0x2c4   : > { %v1062_v34 = vpack.c.bf16 %v1042_v32, %v1042_v32 }
 0x2c6   : > { %1302 = vmatprep.mubr.bf16.mxu1 %v1062_v34 }
 0x2cb   : > { %1303 = vmatmul.mubr.bf16.gmra.mxu1 %v1061_v36 }
 0x343   : > { %v1627_v37 = vpop.f32.mrf.mxu0 }
 0x345   : > { %v1628_v24 = vpop.f32.mrf.mxu0 }
 0x346   : > { %v1629_v39 = vadd.f32 %v1628_v24, %v1627_v37 }
 0x347   : > { %v1630_v40 = vpop.f32.mrf.mxu0 }
 0x348   : > { %v1233_v25 = vadd.f32 %v1629_v39, %v2358_v38 }
 0x349   : > { %v1631_v41 = vpop.f32.mrf.mxu0 }
 0x34a   : > { %v1310_v42 = vsub.f32 0.0, %v1233_v25  ;;  %v1632_v43 = vadd.f32 %v1631_v41, %v1630_v40 }
 0x34b   : > { %v1633_v44 = vpop.f32.mrf.mxu1 }
 0x34c   : > { %v1329_v45 = vmin.f32 %v1310_v42, 60.0  ;;  %v1236_v46 = vadd.f32 %v1632_v43, %v2358_v38 }
 0x34d   : > { %v1634_v47 = vpop.f32.mrf.mxu1 }
 0x34e   : > { %v1348_v48 = vmul.f32 1.442695, %v1329_v45  ;;  %v1311_v49 = vsub.f32 0.0, %v1236_v46  ;;  %v1635_v50 = vadd.f32 %v1634_v47, %v1633_v44 }
 0x34f   : > { %v1636_v51 = vpop.f32.mrf.mxu1 }
 0x350   : > { %1854 = vpow2.f32 %v1348_v48  ;;  %v1330_v52 = vmin.f32 %v1311_v49, 60.0  ;;  %v1241_v54 = vadd.f32 %v1635_v50, %v2358_v38 }
 0x351   : > { %v1637_v55 = vpop.f32.mrf.mxu1 }
 0x352   : > { %v1350_v56 = vmul.f32 1.442695, %v1330_v52  ;;  %v1312_v57 = vsub.f32 0.0, %v1241_v54  ;;  %v1638_v58 = vadd.f32 %v1637_v55, %v1636_v51 }
 0x353   : > { %v1639_v59 = vpop.f32.mrf.mxu1 }
 0x354   : > { %1856 = vpow2.f32 %v1350_v56  ;;  %v1331_v53 = vmin.f32 %v1312_v57, 60.0  ;;  %v1244_v61 = vadd.f32 %v1638_v58, %v2358_v38 }
 0x355   : > { %v1640_v62 = vpop.f32.mrf.mxu1 }
 0x356   : > { %v1352_v63 = vmul.f32 1.442695, %v1331_v53  ;;  %v1313_v0 = vsub.f32 0.0, %v1244_v61  ;;  %v1641_v1 = vadd.f32 %v1640_v62, %v1639_v59 }
 0x357   : > { %v1642_v2 = vpop.f32.mrf.mxu1 }
 0x358   : > { %1858 = vpow2.f32 %v1352_v63  ;;  %v1332_v3 = vmin.f32 %v1313_v0, 60.0  ;;  %v1249_v4 = vadd.f32 %v1641_v1, %v2358_v38 }
 0x359   : > { %v1643_v5 = vpop.f32.mrf.mxu1 }
 0x35a   : > { %v1354_v6 = vmul.f32 1.442695, %v1332_v3  ;;  %v1314_v7 = vsub.f32 0.0, %v1249_v4  ;;  %v1644_v8 = vadd.f32 %v1643_v5, %v1642_v2 }
 0x35b   : > { %v1645_v10 = vpop.f32.mrf.mxu1 }
 0x35c   : > { %1860 = vpow2.f32 %v1354_v6  ;;  %v1333_v11 = vmin.f32 %v1314_v7, 60.0  ;;  %v1252_v12 = vadd.f32 %v1644_v8, %v2358_v38 }
 0x35d   : > { %v1855_v13 = vpop.eup %1854  ;;  %v1646_v14 = vpop.f32.mrf.mxu1 }
 0x35e   : > { %v1386_v9 = vadd.f32 1.0, %v1855_v13  ;;  %v1356_v15 = vmul.f32 1.442695, %v1333_v11  ;;  %v1315_v16 = vsub.f32 0.0, %v1252_v12  ;;  %v1647_v60 = vadd.f32 %v1646_v14, %v1645_v10 }
 0x35f   : > { %v1648_v17 = vpop.f32.mrf.mxu1 }
 0x360   : > { %1862 = vrcp.f32 %v1386_v9  ;;  %v1334_v18 = vmin.f32 %v1315_v16, 60.0  ;;  %v1257_v19 = vadd.f32 %v1647_v60, %v2358_v38 }
 0x361   : > { %v1857_v20 = vpop.eup %1856  ;;  %1864 = vpow2.f32 %v1356_v15  ;;  %v1649_v21 = vpop.f32.mrf.mxu1 }
 0x362   : > { %v1387_v22 = vadd.f32 1.0, %v1857_v20  ;;  %v1358_v23 = vmul.f32 1.442695, %v1334_v18  ;;  %v1316_v26 = vsub.f32 0.0, %v1257_v19  ;;  %v1650_v27 = vadd.f32 %v1649_v21, %v1648_v17 }
 0x363   : > { %v1651_v28 = vpop.f32.mrf.mxu1 }
 0x364   : > { %1866 = vrcp.f32 %v1387_v22  ;;  %v1335_v29 = vmin.f32 %v1316_v26, 60.0  ;;  %v1260_v30 = vadd.f32 %v1650_v27, %v2358_v38 }
 0x365   : > { %v1859_v31 = vpop.eup %1858  ;;  %1868 = vpow2.f32 %v1358_v23  ;;  %v1652_v32 = vpop.f32.mrf.mxu1 }
 0x366   : > { %v1388_v33 = vadd.f32 1.0, %v1859_v31  ;;  %v1360_v34 = vmul.f32 1.442695, %v1335_v29  ;;  %v1317_v35 = vsub.f32 0.0, %v1260_v30  ;;  %v1653_v36 = vadd.f32 %v1652_v32, %v1651_v28 }
 0x367   : > { %v1654_v37 = vpop.f32.mrf.mxu1 }
 0x368   : > { %1870 = vrcp.f32 %v1388_v33  ;;  %v1336_v24 = vmin.f32 %v1317_v35, 60.0  ;;  %v1265_v39 = vadd.f32 %v1653_v36, %v2358_v38 }
 0x369   : > { %v1861_v40 = vpop.eup %1860  ;;  %1872 = vpow2.f32 %v1360_v34  ;;  %v1655_v25 = vpop.f32.mrf.mxu1 }
 0x36a   : > { %v1389_v41 = vadd.f32 1.0, %v1861_v40  ;;  %v1362_v42 = vmul.f32 1.442695, %v1336_v24  ;;  %v1318_v43 = vsub.f32 0.0, %v1265_v39  ;;  %v1656_v44 = vadd.f32 %v1655_v25, %v1654_v37 }
 0x36b   : > { %v1657_v45 = vpop.f32.mrf.mxu1 }
 0x36c   : > { %1874 = vrcp.f32 %v1389_v41  ;;  %v1337_v46 = vmin.f32 %v1318_v43, 60.0  ;;  %v1268_v47 = vadd.f32 %v1656_v44, %v2358_v38 }
 0x36d   : > { %v1863_v48 = vpop.eup %1862  ;;  %1876 = vpow2.f32 %v1362_v42  ;;  %v1658_v49 = vpop.f32.mrf.mxu1 }
 0x36e   : > { %v1865_v50 = vpop.eup %1864  ;;  %1424 = vst [vmem:[%s2373_s22] sm:$0xff] %v1863_v48  ;;  %v1364_v51 = vmul.f32 1.442695, %v1337_v46  ;;  %v1319_v52 = vsub.f32 0.0, %v1268_v47  ;;  %v1659_v54 = vadd.f32 %v1658_v49, %v1657_v45 }
 0x36f   : > { %v1390_v55 = vadd.f32 1.0, %v1865_v50  ;;  %v1660_v56 = vpop.f32.mrf.mxu1 }
 0x370   : > { %1878 = vpow2.f32 %v1364_v51  ;;  %v1338_v57 = vmin.f32 %v1319_v52, 60.0  ;;  %v1273_v58 = vadd.f32 %v1659_v54, %v2358_v38 }
 0x371   : > { %v1867_v59 = vpop.eup %1866  ;;  %1880 = vrcp.f32 %v1390_v55  ;;  %v1661_v53 = vpop.f32.mrf.mxu1 }
 0x372   : > { %v1869_v61 = vpop.eup %1868  ;;  %1425 = vst [vmem:[%s2373_s22 + $0x8] sm:$0xff] %v1867_v59  ;;  %v1366_v62 = vmul.f32 1.442695, %v1338_v57  ;;  %v1320_v63 = vsub.f32 0.0, %v1273_v58  ;;  %v1662_v0 = vadd.f32 %v1661_v53, %v1660_v56 }
 0x373   : > { %v1391_v1 = vadd.f32 1.0, %v1869_v61  ;;  %v1663_v2 = vpop.f32.mrf.mxu1 }
 0x374   : > { %1882 = vpow2.f32 %v1366_v62  ;;  %v1339_v3 = vmin.f32 %v1320_v63, 60.0  ;;  %v1276_v4 = vadd.f32 %v1662_v0, %v2358_v38 }
 0x375   : > { %v1871_v5 = vpop.eup %1870  ;;  %1884 = vrcp.f32 %v1391_v1  ;;  %v1664_v6 = vpop.f32.mrf.mxu1 }
 0x376   : > { %v1873_v7 = vpop.eup %1872  ;;  %1426 = vst [vmem:[%s2373_s22 + $0x10] sm:$0xff] %v1871_v5  ;;  %v1368_v8 = vmul.f32 1.442695, %v1339_v3  ;;  %v1321_v10 = vsub.f32 0.0, %v1276_v4  ;;  %v1665_v11 = vadd.f32 %v1664_v6, %v1663_v2 }
 0x377   : > { %v1392_v12 = vadd.f32 1.0, %v1873_v7  ;;  %v1666_v13 = vpop.f32.mrf.mxu1 }
 0x378   : > { %1886 = vpow2.f32 %v1368_v8  ;;  %v1340_v14 = vmin.f32 %v1321_v10, 60.0  ;;  %v1281_v9 = vadd.f32 %v1665_v11, %v2358_v38 }
 0x379   : > { %v1875_v15 = vpop.eup %1874  ;;  %1888 = vrcp.f32 %v1392_v12  ;;  %v1667_v16 = vpop.f32.mrf.mxu1 }
 0x37a   : > { %v1877_v60 = vpop.eup %1876  ;;  %1427 = vst [vmem:[%s2373_s22 + $0x18] sm:$0xff] %v1875_v15  ;;  %v1370_v17 = vmul.f32 1.442695, %v1340_v14  ;;  %v1322_v18 = vsub.f32 0.0, %v1281_v9  ;;  %v1668_v19 = vadd.f32 %v1667_v16, %v1666_v13 }
 0x37b   : > { %v1393_v20 = vadd.f32 1.0, %v1877_v60  ;;  %v1669_v21 = vpop.f32.mrf.mxu1 }
 0x37c   : > { %1890 = vpow2.f32 %v1370_v17  ;;  %v1341_v22 = vmin.f32 %v1322_v18, 60.0  ;;  %v1284_v23 = vadd.f32 %v1668_v19, %v2358_v38 }
 0x37d   : > { %v1879_v26 = vpop.eup %1878  ;;  %1892 = vrcp.f32 %v1393_v20  ;;  %v1670_v27 = vpop.f32.mrf.mxu1 }
 0x37e   : > { %v1881_v28 = vpop.eup %1880  ;;  %v1394_v29 = vadd.f32 1.0, %v1879_v26  ;;  %v1372_v30 = vmul.f32 1.442695, %v1341_v22  ;;  %v1323_v31 = vsub.f32 0.0, %v1284_v23  ;;  %v1671_v32 = vadd.f32 %v1670_v27, %v1669_v21 }
 0x37f   : > { %1428 = vst [vmem:[%s2373_s22 + $0x20] sm:$0xff] %v1881_v28  ;;  %v1672_v33 = vpop.f32.mrf.mxu1 }
 0x380   : > { %1894 = vrcp.f32 %v1394_v29  ;;  %v1342_v34 = vmin.f32 %v1323_v31, 60.0  ;;  %v1289_v35 = vadd.f32 %v1671_v32, %v2358_v38 }
 0x381   : > { %v1883_v36 = vpop.eup %1882  ;;  %1896 = vpow2.f32 %v1372_v30  ;;  %v1673_v37 = vpop.f32.mrf.mxu1 }
 0x382   : > { %v1885_v24 = vpop.eup %1884  ;;  %v1395_v39 = vadd.f32 1.0, %v1883_v36  ;;  %v1374_v40 = vmul.f32 1.442695, %v1342_v34  ;;  %v1324_v25 = vsub.f32 0.0, %v1289_v35  ;;  %v1674_v41 = vadd.f32 %v1673_v37, %v1672_v33 }
 0x383   : > { %1429 = vst [vmem:[%s2373_s22 + $0x28] sm:$0xff] %v1885_v24  ;;  %v1675_v42 = vpop.f32.mrf.mxu1 }
 0x384   : > { %1898 = vrcp.f32 %v1395_v39  ;;  %v1343_v43 = vmin.f32 %v1324_v25, 60.0  ;;  %v1292_v44 = vadd.f32 %v1674_v41, %v2358_v38 }
 0x385   : > { %v1887_v45 = vpop.eup %1886  ;;  %1900 = vpow2.f32 %v1374_v40  ;;  %v1676_v46 = vpop.f32.mrf.mxu1 }
 0x386   : > { %v1889_v47 = vpop.eup %1888  ;;  %v1396_v48 = vadd.f32 1.0, %v1887_v45  ;;  %v1376_v49 = vmul.f32 1.442695, %v1343_v43  ;;  %v1325_v50 = vsub.f32 0.0, %v1292_v44  ;;  %v1677_v51 = vadd.f32 %v1676_v46, %v1675_v42 }
 0x387   : > { %1430 = vst [vmem:[%s2373_s22 + $0x30] sm:$0xff] %v1889_v47  ;;  %v1678_v52 = vpop.f32.mrf.mxu1 }
 0x388   : > { %1902 = vrcp.f32 %v1396_v48  ;;  %v1344_v54 = vmin.f32 %v1325_v50, 60.0  ;;  %v1297_v55 = vadd.f32 %v1677_v51, %v2358_v38 }
 0x389   : > { %v1891_v56 = vpop.eup %1890  ;;  %1904 = vpow2.f32 %v1376_v49  ;;  %v1679_v57 = vpop.f32.mrf.mxu1 }
 0x38a   : > { %v1893_v58 = vpop.eup %1892  ;;  %v1397_v59 = vadd.f32 1.0, %v1891_v56  ;;  %v1378_v53 = vmul.f32 1.442695, %v1344_v54  ;;  %v1326_v61 = vsub.f32 0.0, %v1297_v55  ;;  %v1680_v62 = vadd.f32 %v1679_v57, %v1678_v52 }
 0x38b   : > { %1431 = vst [vmem:[%s2373_s22 + $0x38] sm:$0xff] %v1893_v58  ;;  %v1681_v63 = vpop.f32.mrf.mxu1 }
 0x38c   : > { %1906 = vrcp.f32 %v1397_v59  ;;  %v1345_v0 = vmin.f32 %v1326_v61, 60.0  ;;  %v1300_v1 = vadd.f32 %v1680_v62, %v2358_v38 }
 0x38d   : > { %v1895_v2 = vpop.eup %1894  ;;  %1908 = vpow2.f32 %v1378_v53  ;;  %v1682_v3 = vpop.f32.mrf.mxu1 }
 0x38e   : > { %v1897_v4 = vpop.eup %1896  ;;  %1432 = vst [vmem:[%s2373_s22 + $0x40] sm:$0xff] %v1895_v2  ;;  %v1380_v5 = vmul.f32 1.442695, %v1345_v0  ;;  %v1327_v6 = vsub.f32 0.0, %v1300_v1  ;;  %v1683_v7 = vadd.f32 %v1682_v3, %v1681_v63 }
 0x38f   : > { %v1398_v8 = vadd.f32 1.0, %v1897_v4  ;;  %v1684_v10 = vpop.f32.mrf.mxu1 }
 0x390   : > { %1910 = vpow2.f32 %v1380_v5  ;;  %v1346_v11 = vmin.f32 %v1327_v6, 60.0  ;;  %v1305_v12 = vadd.f32 %v1683_v7, %v2358_v38 }
 0x391   : > { %v1899_v13 = vpop.eup %1898  ;;  %1912 = vrcp.f32 %v1398_v8  ;;  %v1685_v14 = vpop.f32.mrf.mxu1 }
 0x392   : > { %v1901_v9 = vpop.eup %1900  ;;  %1433 = vst [vmem:[%s2373_s22 + $0x48] sm:$0xff] %v1899_v13  ;;  %v1382_v15 = vmul.f32 1.442695, %v1346_v11  ;;  %v1328_v16 = vsub.f32 0.0, %v1305_v12 }
 0x393   : > { %v1399_v60 = vadd.f32 1.0, %v1901_v9 }
 0x394   : > { %1914 = vpow2.f32 %v1382_v15  ;;  %v1347_v17 = vmin.f32 %v1328_v16, 60.0 }
 0x395   : > { %v1903_v18 = vpop.eup %1902  ;;  %1916 = vrcp.f32 %v1399_v60 }
 0x396   : > { %v1905_v19 = vpop.eup %1904  ;;  %1434 = vst [vmem:[%s2373_s22 + $0x50] sm:$0xff] %v1903_v18  ;;  %v1384_v20 = vmul.f32 1.442695, %v1347_v17 }
 0x397   : > { %v1400_v21 = vadd.f32 1.0, %v1905_v19 }
 0x398   : > { %1918 = vpow2.f32 %v1384_v20 }
 0x399   : > { %v1907_v38 = vpop.eup %1906  ;;  %1920 = vrcp.f32 %v1400_v21 }
 0x39a   : > { %v1909_v22 = vpop.eup %1908  ;;  %1435 = vst [vmem:[%s2373_s22 + $0x58] sm:$0xff] %v1907_v38 }
 0x39b   : > { %v1401_v23 = vadd.f32 1.0, %v1909_v22 }
 0x39d   : > { %v1911_v26 = vpop.eup %1910  ;;  %1922 = vrcp.f32 %v1401_v23 }
 0x39e   : > { %v1913_v27 = vpop.eup %1912  ;;  %v1402_v28 = vadd.f32 1.0, %v1911_v26 }
 0x39f   : > { %1436 = vst [vmem:[%s2373_s22 + $0x60] sm:$0xff] %v1913_v27 }
 0x3a0   : > { %1924 = vrcp.f32 %v1402_v28 }
 0x3a1   : > { %v1915_v29 = vpop.eup %1914 }
 0x3a2   : > { %v1917_v30 = vpop.eup %1916  ;;  %v1403_v31 = vadd.f32 1.0, %v1915_v29 }
 0x3a3   : > { %1437 = vst [vmem:[%s2373_s22 + $0x68] sm:$0xff] %v1917_v30 }
 0x3a4   : > { %1926 = vrcp.f32 %v1403_v31 }
 0x3a5   : > { %v1919_v32 = vpop.eup %1918 }
 0x3a6   : > { %v1921_v33 = vpop.eup %1920  ;;  %v1404_v34 = vadd.f32 1.0, %v1919_v32 }
 0x3a7   : > { %1438 = vst [vmem:[%s2373_s22 + $0x70] sm:$0xff] %v1921_v33 }
 0x3a8   : > { %1928 = vrcp.f32 %v1404_v34 }
 0x3aa   : > { %v1923_v35 = vpop.eup %1922 }
 0x3ab   : > { %1439 = vst [vmem:[%s2373_s22 + $0x78] sm:$0xff] %v1923_v35 }
 0x3ad   : > { %v1925_v36 = vpop.eup %1924 }
 0x3ae   : > { %1440 = vst [vmem:[%s2373_s22 + $0x80] sm:$0xff] %v1925_v36 }
 0x3b1   : > { %v1927_v37 = vpop.eup %1926 }
 0x3b2   : > { %1441 = vst [vmem:[%s2373_s22 + $0x88] sm:$0xff] %v1927_v37 }
 0x3b5   : > { %v1929_v24 = vpop.eup %1928 }
 0x3b6   : > { %1442 = vst [vmem:[%s2373_s22 + $0x90] sm:$0xff] %v1929_v24 }
 0x3b7   : > { %1943 = shalt.err (!%p1940_p3)
}
 0x3b8   : > { %s1944_s17 = scalar_lea.hbm %s2407_s27, 2432  ;;  %s1948_s24 = scalar_lea.hbm %s2463_s9, 4864 }
 0x3b9   : > { %p1945_p4 = scmp.ne.s32.totalorder %s2407_s27, %s1944_s17  ;;  %p1949_p9 = scmp.lt.s32.totalorder %s2407_s27, %s2463_s9 }
 0x3ba   : > { %p1950_p10 = scmp.lt.s32.totalorder %s1948_s24, %s1944_s17 }
 0x3bb   : > { %p1946_p7 = pnand %p1945_p4, %p2084_p5 }
 0x3bc   : > { %p1951_p11 = por %p1950_p10, %p1949_p9 }
 0x3bd   : > { %p1947_p8 = pneg %p1946_p7 }
 0x3bf   : > { %p1952_p12 = pnand %p1951_p11, %p1947_p8 }
 0x3c1   : > { %1955 = shalt.err (!%p1952_p12)
}
 0x3c2   : > { %s1994_s29 = smov 128   ;;  %s1995_s13 = smov 8  }
 0x3c3   : > { %1763 = dma.vmem_to_hbm [thread:$0]  (%p2084_p5), %s2409_s23, 2432, %s2407_s27, %s2414_s28, %s1994_s29, %s1994_s29, %s1995_s13  }
 0x3c4 PF: > { %p1769_p13 = scmp.ge.s32.totalorder %s1990_s12, 2  ;;  %s1472_s14 = sand.u32 1, %s1978_s30  }
 0x3c5   : > { %s1473_s16 = scalar_lea.sflag [#allocation3], %s1472_s14 }
 0x3c6   : > { %p1766_p0 = pnand %p1769_p13, %p2088_p6 }
 0x3c8   : > { %p1767_p1 = pneg %p1766_p0 }
 0x3ca   : > { %1973 = dma.done.wait (%p1767_p1), %s1473_s16, 2432  }
 0x3cb   : > { %1975 = vsyncadd (%p1767_p1), %s1473_s16, 4294964864  ;;  %p19_p2 = scmp.ge.s32.totalorder %s2071_s15, 4   ;;  %s2466_s30 = smov %s1982_s10 }
 0x3cc   : > { %s2467_s10 = smov %s1986_s11  ;;  %s2468_s11 = smov %s2082_s18 }
 0x3cd   : > { %s2469_s12 = smov %s2071_s15  ;;  %21 = sbr.rel (!%p19_p2) target bundleno = 3 (0x3), region = 91 }
 0x3d2   :  { %1478 = vsyncpa [#allocation3], 1 }
 0x3d3   :  { %1480 = vsyncpa [#allocation3 + $0x1], 1 }

</bundles_post_ra>
